<compile_context>
chip_gen: v5e
topology: v5e:2x2
jax: 0.10.0
libtpu: 0.0.40
codegen_flags: <defaults>
</compile_context>

<pallas_src>
import jax
import jax.numpy as jnp
from jax.experimental import pallas as pl
from jax.experimental.pallas import tpu as pltpu

_LANES = 128


def _linear_sigmoid_kernel(w_ref, b_ref, x_ref, o_ref):
    # w_ref / b_ref are SMEM scalars (Linear(1,1): weight [1,1], bias [1]).
    w = w_ref[0]
    b = b_ref[0]
    y = x_ref[...] * w + b                       # VPU mul-add
    # Exact sigmoid with a single EUP transcendental (tanh); the adds/muls
    # ride free VALU slots, so the kernel stays DMA-bound on v5e/v6e/v7x.
    o_ref[...] = 0.5 * jnp.tanh(0.5 * y) + 0.5


def _linear_sigmoid_pallas(x_flat, w_flat, bias, tile_rows):
    n = x_flat.shape[0]
    assert n % _LANES == 0, "pallas path requires n % 128 == 0 (zero-copy view)"
    rows = n // _LANES

    # Megacore balance: prefer >= ~8 grid steps over one huge tile so the
    # 2 TensorCores on v7x both get work; round to a multiple of 8 sublanes.
    tile_rows_eff = max(8, min(tile_rows, -(-rows // 8)))
    tile_rows_eff = -(-tile_rows_eff // 8) * 8
    grid = (pl.cdiv(rows, tile_rows_eff),)       # ragged last block is fine

    # Zero-copy lane-dense view: [N] -> [rows, 128].
    xm = x_flat.reshape(rows, _LANES)

    out = pl.pallas_call(
        _linear_sigmoid_kernel,
        out_shape=jax.ShapeDtypeStruct((rows, _LANES), x_flat.dtype),
        grid=grid,
        in_specs=[
            pl.BlockSpec(memory_space=pltpu.SMEM),            # weight scalar
            pl.BlockSpec(memory_space=pltpu.SMEM),            # bias scalar
            pl.BlockSpec((tile_rows_eff, _LANES), lambda i: (i, 0)),
        ],
        out_specs=pl.BlockSpec((tile_rows_eff, _LANES), lambda i: (i, 0)),
        compiler_params=pltpu.CompilerParams(
            dimension_semantics=("parallel",),
        ),
        cost_estimate=pl.CostEstimate(
            flops=5 * rows * _LANES,              # mul, add, 0.5*, +0.5, ...
            transcendentals=rows * _LANES,        # one tanh per element
            bytes_accessed=8 * rows * _LANES,     # f32 in + f32 out
        ),
    )(w_flat, bias, xm)

    return out.reshape(n)                        # zero-copy reshape back


def linear_sigmoid(x, weight, bias, *, min_pallas_elems=1 << 20, tile_rows=2048):
    """x: [N, 1] f32, weight: [1, 1] f32, bias: [1] f32 -> [N, 1] f32.

    Dispatch: the Pallas kernel is used only when it can be zero-copy
    (n % 128 == 0) and the problem is large enough (>= min_pallas_elems,
    default 1M elements = 4 MiB) to amortize kernel dispatch; otherwise the
    fused XLA elementwise path (already at HBM roofline) is used.
    """
    n, f = x.shape
    assert f == 1 and weight.shape == (1, 1) and bias.shape == (1,), (
        "kernel assumes Linear(1, 1); scalar-broadcast trick breaks otherwise"
    )
    assert tile_rows % 8 == 0, "tile_rows must be a multiple of 8 sublanes"

    w_flat = weight.reshape(1)

    use_pallas = (n % _LANES == 0) and (n * f >= min_pallas_elems)
    if not use_pallas:
        return jax.nn.sigmoid(x * w_flat[0] + bias[0])

    out_flat = _linear_sigmoid_pallas(x.reshape(-1), w_flat, bias, tile_rows)
    return out_flat.reshape(n, f)


if __name__ == "__main__":
    key = jax.random.PRNGKey(0)
    kx, kw, kb = jax.random.split(key, 3)

    weight = jax.random.normal(kw, (1, 1), dtype=jnp.float32) * 0.5
    bias = jax.random.normal(kb, (1,), dtype=jnp.float32) * 0.1

    # 1) Module-scale shape (batch=8, feature=1): tiny -> fused-XLA fast path.
    x_small = jax.random.normal(kx, (8, 1), dtype=jnp.float32)
    ref_small = jax.nn.sigmoid(x_small @ weight.T + bias)
    out_small = linear_sigmoid(x_small, weight, bias)
    jax.block_until_ready(out_small)
    assert jnp.allclose(out_small, ref_small, atol=1e-5), "jax path mismatch"

    # 2) Force the Pallas path: zero-copy (n % 128 == 0), single grid step.
    x_mid = jax.random.normal(kx, (1024, 1), dtype=jnp.float32)
    ref_mid = jax.nn.sigmoid(x_mid @ weight.T + bias)
    out_mid = linear_sigmoid(x_mid, weight, bias, min_pallas_elems=0, tile_rows=8)
    jax.block_until_ready(out_mid)
    assert jnp.allclose(out_mid, ref_mid, atol=1e-4), "pallas path mismatch (1024)"

    # 3) Multiple grid steps + ragged last block (rows=25, tile=8 -> grid=4).
    x_big = jax.random.normal(kx, (3200, 1), dtype=jnp.float32)
    ref_big = jax.nn.sigmoid(x_big @ weight.T + bias)
    out_big = linear_sigmoid(x_big, weight, bias, min_pallas_elems=0, tile_rows=8)
    jax.block_until_ready(out_big)
    assert jnp.allclose(out_big, ref_big, atol=1e-4), "pallas path mismatch (3200)"

    print("KERNEL_OK")
</pallas_src>

<mosaic_0001>
module attributes {stable_mosaic.version = 11 : i64} {
  func.func @_linear_sigmoid_kernel(%arg0: i32, %arg1: memref<1xf32, #tpu.memory_space<smem>>, %arg2: memref<1xf32, #tpu.memory_space<smem>>, %arg3: memref<8x128xf32, #tpu.memory_space<vmem>>, %arg4: memref<8x128xf32, #tpu.memory_space<vmem>>) attributes {dimension_semantics = [#tpu.dimension_semantics<parallel>], iteration_bounds = array<i64: 1>, scalar_prefetch = 0 : i64, scratch_operands = 0 : i64, tpu.core_type = #tpu.core_type<tc>, window_params = [{transform_indices = @transform_0, window_bounds = array<i64: 1>}, {transform_indices = @transform_1, window_bounds = array<i64: 1>}, {transform_indices = @transform_2, window_bounds = array<i64: 8, 128>}, {transform_indices = @transform_3, window_bounds = array<i64: 8, 128>}]} {
    %c0 = arith.constant 0 : index
    %0 = memref.load %arg1[%c0] : memref<1xf32, #tpu.memory_space<smem>>
    %c0_0 = arith.constant 0 : index
    %1 = memref.load %arg2[%c0_0] : memref<1xf32, #tpu.memory_space<smem>>
    %c0_1 = arith.constant 0 : index
    %c0_2 = arith.constant 0 : index
    %2 = vector.load %arg3[%c0_1, %c0_2] : memref<8x128xf32, #tpu.memory_space<vmem>>, vector<8x128xf32>
    %3 = vector.broadcast %0 : f32 to vector<8x128xf32>
    %4 = arith.mulf %2, %3 : vector<8x128xf32>
    %5 = vector.broadcast %1 : f32 to vector<8x128xf32>
    %6 = arith.addf %4, %5 : vector<8x128xf32>
    %cst = arith.constant 5.000000e-01 : f32
    %7 = vector.broadcast %cst : f32 to vector<8x128xf32>
    %8 = arith.mulf %7, %6 : vector<8x128xf32>
    %9 = math.tanh %8 : vector<8x128xf32>
    %cst_3 = arith.constant 5.000000e-01 : f32
    %10 = vector.broadcast %cst_3 : f32 to vector<8x128xf32>
    %11 = arith.mulf %10, %9 : vector<8x128xf32>
    %cst_4 = arith.constant 5.000000e-01 : f32
    %12 = vector.broadcast %cst_4 : f32 to vector<8x128xf32>
    %13 = arith.addf %11, %12 : vector<8x128xf32>
    %c0_5 = arith.constant 0 : index
    %c0_6 = arith.constant 0 : index
    %14 = vector.load %arg4[%c0_5, %c0_6] : memref<8x128xf32, #tpu.memory_space<vmem>>, vector<8x128xf32>
    tpu.vector_store %arg4[%c0_5, %c0_6], %13 {strides = array<i32>} : memref<8x128xf32, #tpu.memory_space<vmem>>, vector<8x128xf32>,
    return
  }
  func.func @transform_0(%arg0: i32) -> i32 {
    %c0_i32 = arith.constant 0 : i32
    %c0_i32_0 = arith.constant 0 : i32
    return %c0_i32 : i32
  }
  func.func @transform_1(%arg0: i32) -> i32 {
    %c0_i32 = arith.constant 0 : i32
    %c0_i32_0 = arith.constant 0 : i32
    return %c0_i32 : i32
  }
  func.func @transform_2(%arg0: i32) -> (i32, i32) {
    %c0_i32 = arith.constant 0 : i32
    %c0_i32_0 = arith.constant 0 : i32
    return %arg0, %c0_i32 : i32, i32
  }
  func.func @transform_3(%arg0: i32) -> (i32, i32) {
    %c0_i32 = arith.constant 0 : i32
    %c0_i32_0 = arith.constant 0 : i32
    return %arg0, %c0_i32 : i32, i32
  }
}

</mosaic_0001>

<bundles_post_ra>
// kernel: tpu_custom_call.1
= control target key start
LH: loop header
LB: loop body
LE: loop exit
PB: predicated region body
PF: predicated region fallthrough
CT: control target
= control target key end

     0   :  { %10 = vsyncpa [#allocation5], 0  ;;  %s150_s0 = inlined_call_operand.<no memory space> [shape: f32[1], index: 0, kind: input, shape index: {}]   ;;  %s151_s1 = inlined_call_operand.<no memory space> [shape: f32[1], index: 1, kind: input, shape index: {}]   ;;  %s152_s2 = inlined_call_operand.hbm [shape: f32[8,128], index: 2, kind: input, shape index: {}]   ;;  %s153_s3 = inlined_call_operand.hbm [shape: f32[8,128], index: 3, kind: output, shape index: {}]  }
   0x1   :  { %11 = vsyncpa [#allocation6], 0  ;;  %s21_s14 = sshll.u32 %s152_s2, 4  ;;  %s116_s15 = smov [#allocation4]   ;;  %s22_s14 = int_to_ptr.hbm [resolvable:$true] %s21_s14 }
   0x2   :  { %s23_s16 = sshll.u32 %s116_s15, 4  ;;  %s24_s16 = int_to_ptr.vmem [resolvable:$true] %s23_s16 }
   0x3   :  { %26 = dma.hbm_to_vmem [thread:$0]  %s22_s14, 128, %s24_s16, [#allocation5]  }
   0x4   :  { %112 = dma.done.wait [#allocation5], 128  }
   0x5   :  { %113 = vsyncadd [#allocation5], 4294967168  ;;  %v34_v0 = vstv %s150_s0  ;;  %v33_v1 = vld [vmem:[#allocation4] sm:$0xff]  ;;  %v36_v2 = vstv %s151_s1  ;;  %s117_s2 = smov [#allocation7]   ;;  %s50_s24 = sshll.u32 %s153_s3, 4  ;;  %s51_s24 = int_to_ptr.hbm [resolvable:$true] %s50_s24 }
   0x6   :  { %v35_v3 = vmul.f32 %v34_v0, %v33_v1  ;;  %s48_s21 = sshll.u32 %s117_s2, 4  ;;  %s49_s21 = int_to_ptr.vmem [resolvable:$true] %s48_s21 }
   0x8   :  { %v37_v4 = vadd.f32 %v36_v2, %v35_v3 }
   0xa   :  { %v38_v5 = vmul.f32 0.5, %v37_v4 }
   0xc   :  { %62 = vtanh.f32 %v38_v5 }
  0x12   :  { %v63_v6 = vpop.eup %62 }
  0x13   :  { %v40_v7 = vmul.f32 0.5, %v63_v6 }
  0x15   :  { %v41_v8 = vadd.f32 0.5, %v40_v7 }
  0x17   :  { %42 = vst [vmem:[#allocation7] sm:$0xff] %v41_v8 }
  0x18   :  { %53 = dma.vmem_to_hbm [thread:$0]  %s49_s21, 128, %s51_s24, [#allocation6]  }
  0x19   :  { %114 = dma.done.wait [#allocation6], 128  }
  0x1a   :  { %115 = vsyncadd [#allocation6], 4294967168 }
  0x1b   :  { %58 = vsyncpa [#allocation5], 1 }
  0x1c   :  { %59 = vsyncpa [#allocation6], 1 }

</bundles_post_ra>
